<compile_context>
chip_gen: v6e
topology: v6e:2x2x1
jax: 0.10.0
libtpu: 0.0.40
codegen_flags: <defaults>
</compile_context>

<pallas_src>
import jax
import jax.numpy as jnp
from jax.experimental import pallas as pl
from jax.experimental.pallas import tpu as pltpu

_LANE = 128
_ROW_ALIGN = 32                  # covers sublane packing for f32/bf16/int8/fp8
_BLOCK_BYTES = 1 << 20           # ~1 MiB blocks saturate the HBM roofline
_VMEM_LIMIT_BYTES = 32 << 20     # modest scoped-VMEM request (fits v7x 64 MiB)


def _copy_kernel(x_ref, o_ref):
    o_ref[...] = x_ref[...]


def _choose_cols(n):
    """Largest lane-dense width (multiple of 128) dividing n, up to 8192."""
    for c in (8192, 4096, 2048, 1024, 512, 256, 128):
        if n % c == 0:
            return c
    return None


def _block_spec(block_shape, index_map, n_buffers):
    """BlockSpec with optional deeper buffering (a copy is 100% DMA-bound)."""
    if n_buffers > 2 and hasattr(pl, "Buffered"):
        try:
            return pl.BlockSpec(block_shape, index_map,
                                pipeline_mode=pl.Buffered(n_buffers))
        except TypeError:
            pass
    return pl.BlockSpec(block_shape, index_map)


def _row_block(rows, row_bytes):
    """32-row-aligned block of <=~1 MiB, with >=2 grid steps when possible."""
    if rows <= _ROW_ALIGN:
        return rows                                   # full-extent tiny block
    tr = max(_ROW_ALIGN,
             (_BLOCK_BYTES // row_bytes // _ROW_ALIGN) * _ROW_ALIGN)
    # Guarantee at least two blocks: overlaps the input DMA with the output
    # writeback and lets the 'parallel' axis shard across both v7x TCs.
    tr = min(tr, ((rows - 1) // _ROW_ALIGN) * _ROW_ALIGN)
    return max(_ROW_ALIGN, tr)


def _pallas_copy_2d(x2d):
    """Identity copy of a lane-dense 2D slab through a Pallas TPU kernel."""
    rows, cols = x2d.shape
    itemsize = x2d.dtype.itemsize
    tr = _row_block(rows, cols * itemsize)
    grid = (pl.cdiv(rows, tr),)
    n_buf = 3 if grid[0] >= 4 else 2   # deeper pipeline only for long grids

    return pl.pallas_call(
        _copy_kernel,
        out_shape=jax.ShapeDtypeStruct((rows, cols), x2d.dtype),
        grid_spec=pltpu.PrefetchScalarGridSpec(
            num_scalar_prefetch=0,
            grid=grid,
            in_specs=[_block_spec((tr, cols), lambda i: (i, 0), n_buf)],
            out_specs=_block_spec((tr, cols), lambda i: (i, 0), n_buf),
        ),
        compiler_params=pltpu.CompilerParams(
            dimension_semantics=("parallel",),
            vmem_limit_bytes=_VMEM_LIMIT_BYTES,
        ),
        cost_estimate=pl.CostEstimate(
            flops=0,
            transcendentals=0,
            bytes_accessed=2 * rows * cols * itemsize,
        ),
    )(x2d)


def squeeze(x, dim, *, alias_input=False):
    """Pallas-backed equivalent of torch.Tensor.squeeze(dim)."""
    ndim = x.ndim
    if dim < 0:
        dim += ndim

    # PyTorch: only remove the dim if its size is 1, otherwise unchanged.
    if x.shape[dim] == 1:
        out_shape = tuple(s for i, s in enumerate(x.shape) if i != dim)
    else:
        out_shape = x.shape

    n = x.size
    if alias_input or n == 0:
        # Donated buffer / empty tensor: squeeze is metadata-only -> zero-copy.
        return x.reshape(out_shape)

    cols = _choose_cols(n)
    if cols is None:
        # Ragged element count: pad+copy+slice would move ~4N bytes for a
        # metadata-only op, so take the zero-copy reshape instead.
        # TODO(synk): route ragged sizes through a direct HBM->HBM DMA copy if
        # a kernel invocation is ever strictly required for them.
        return x.reshape(out_shape)

    y = _pallas_copy_2d(x.reshape(-1, cols))
    return y.reshape(out_shape)


class Squeeze:
    """Mirror of the PyTorch nn.Module."""

    def __init__(self, dim):
        self.dim = dim

    def __call__(self, x):
        return squeeze(x, self.dim)


if __name__ == "__main__":
    key = jax.random.PRNGKey(0)
    k0, k1, k2, k3 = jax.random.split(key, 4)

    # NCHW input with a size-1 channel dim (what the module is used for).
    x = jax.random.normal(k0, (2, 1, 16, 16), dtype=jnp.float32)
    mod = Squeeze(dim=1)
    y = jax.block_until_ready(mod(x))
    assert y.shape == (2, 16, 16), y.shape
    assert jnp.array_equal(y, jnp.squeeze(x, axis=1)), "mismatch vs reference"

    # No-op case: dim size != 1 -> tensor unchanged (PyTorch semantics).
    x2 = jax.random.normal(k1, (2, 4, 16, 16), dtype=jnp.float32)
    y2 = jax.block_until_ready(Squeeze(1)(x2))
    assert y2.shape == x2.shape
    assert jnp.array_equal(y2, x2)

    # Ragged element count (105 elems): zero-copy reshape path, negative dim.
    x3 = jax.random.normal(k2, (3, 5, 1, 7), dtype=jnp.float32)
    y3 = jax.block_until_ready(Squeeze(-2)(x3))
    assert y3.shape == (3, 5, 7), y3.shape
    assert jnp.array_equal(y3, jnp.squeeze(x3, axis=2))

    # Multi-block path: 65 * 128 elements -> (65, 128) slab, 2 grid steps with
    # a masked 1-row trailing block.
    x4 = jax.random.normal(k3, (65, 1, 128), dtype=jnp.float32)
    y4 = jax.block_until_ready(Squeeze(1)(x4))
    assert y4.shape == (65, 128), y4.shape
    assert jnp.array_equal(y4, jnp.squeeze(x4, axis=1))

    # Donated-buffer fast path: pure reshape, no kernel, no HBM traffic.
    y5 = jax.block_until_ready(squeeze(x, 1, alias_input=True))
    assert jnp.array_equal(y5, jnp.squeeze(x, axis=1))

    print("KERNEL_OK")
</pallas_src>

<mosaic_0001>
module attributes {stable_mosaic.version = 11 : i64} {
  func.func @_copy_kernel(%arg0: i32, %arg1: memref<1x512xf32, #tpu.memory_space<vmem>>, %arg2: memref<1x512xf32, #tpu.memory_space<vmem>>) attributes {dimension_semantics = [#tpu.dimension_semantics<parallel>], iteration_bounds = array<i64: 1>, scalar_prefetch = 0 : i64, scratch_operands = 0 : i64, tpu.core_type = #tpu.core_type<tc>, window_params = [{transform_indices = @transform_0, window_bounds = array<i64: 1, 512>}, {transform_indices = @transform_1, window_bounds = array<i64: 1, 512>}]} {
    %c0 = arith.constant 0 : index
    %c0_0 = arith.constant 0 : index
    %0 = vector.load %arg1[%c0, %c0_0] : memref<1x512xf32, #tpu.memory_space<vmem>>, vector<1x512xf32>
    %c0_1 = arith.constant 0 : index
    %c0_2 = arith.constant 0 : index
    %1 = vector.load %arg2[%c0_1, %c0_2] : memref<1x512xf32, #tpu.memory_space<vmem>>, vector<1x512xf32>
    tpu.vector_store %arg2[%c0_1, %c0_2], %0 {strides = array<i32>} : memref<1x512xf32, #tpu.memory_space<vmem>>, vector<1x512xf32>,
    return
  }
  func.func @transform_0(%arg0: i32) -> (i32, i32) {
    %c0_i32 = arith.constant 0 : i32
    %c0_i32_0 = arith.constant 0 : i32
    return %arg0, %c0_i32 : i32, i32
  }
  func.func @transform_1(%arg0: i32) -> (i32, i32) {
    %c0_i32 = arith.constant 0 : i32
    %c0_i32_0 = arith.constant 0 : i32
    return %arg0, %c0_i32 : i32, i32
  }
}

</mosaic_0001>

<bundles_post_ra>
// kernel: tpu_custom_call.1
= control target key start
LH: loop header
LB: loop body
LE: loop exit
PB: predicated region body
PF: predicated region fallthrough
CT: control target
= control target key end

     0   :  { %6 = vsyncpa [#allocation3], 0  ;;  %s106_s0 = inlined_call_operand.hbm [shape: f32[1,512], index: 0, kind: input, shape index: {}]   ;;  %s107_s1 = inlined_call_operand.hbm [shape: f32[1,512], index: 1, kind: output, shape index: {}]  }
   0x1   :  { %7 = vsyncpa [#allocation4], 0  ;;  %s88_s6 = smov [#allocation2]  }
   0x2   :  { %s14_s7 = sshll.u32 %s88_s6, 4  ;;  %s15_s7 = int_to_ptr.vmem [resolvable:$true] %s14_s7 }
   0x3   :  { %s52_s8 = scalar_lea.vmem %s15_s7, 64  ;;  %p57_p1 = scmp.lt.s32.totalorder %s15_s7, %s15_s7 }
   0x4   :  { %p53_p0 = scmp.ne.s32.totalorder %s15_s7, %s52_s8  ;;  %p58_p2 = scmp.lt.s32.totalorder %s52_s8, %s52_s8 }
   0x6   :  { %p59_p3 = por %p58_p2, %p57_p1 }
   0x8   :  { %p60_p4 = pnand %p59_p3, %p53_p0 }
   0xa   :  { %63 = shalt.err (!%p60_p4)
}
   0xb   :  { %17 = dma.hbm_to_vmem [thread:$0]  %s106_s0, 64, %s15_s7, [#allocation3]  }
   0xc   :  { %84 = dma.done.wait [#allocation3], 64  }
   0xd   :  { %85 = vsyncadd [#allocation3], 4294967232  ;;  %v22_v0 = vlaneseq  ;;  %s89_s11 = smov [#allocation5]   ;;  %v21_v1 = vld [vmem:[#allocation2] sm:$0xf] }
   0xe   :  { %s33_s12 = sshll.u32 %s89_s11, 4  ;;  %s34_s12 = int_to_ptr.vmem [resolvable:$true] %s33_s12 }
   0xf   :  { %vm24_vm0 = vcmp.lt.s32.totalorder %v22_v0, 512  ;;  %s64_s13 = scalar_lea.vmem %s34_s12, 64  ;;  %p69_p6 = scmp.lt.s32.totalorder %s34_s12, %s34_s12 }
  0x10   :  { %26 = vst.msk [vmem:[#allocation5] sm:$0xf] %vm24_vm0, %v21_v1  ;;  %p65_p5 = scmp.ne.s32.totalorder %s34_s12, %s64_s13  ;;  %p70_p7 = scmp.lt.s32.totalorder %s64_s13, %s64_s13 }
  0x12   :  { %p71_p8 = por %p70_p7, %p69_p6 }
  0x14   :  { %p72_p9 = pnand %p71_p8, %p65_p5 }
  0x16   :  { %75 = shalt.err (!%p72_p9)
}
  0x17   :  { %36 = dma.vmem_to_hbm [thread:$0]  %s34_s12, 64, %s107_s1, [#allocation4]  }
  0x18   :  { %86 = dma.done.wait [#allocation4], 64  }
  0x19   :  { %87 = vsyncadd [#allocation4], 4294967232 }
  0x1a   :  { %40 = vsyncpa [#allocation3], 1 }
  0x1b   :  { %41 = vsyncpa [#allocation4], 1 }

</bundles_post_ra>
